<compile_context>
chip_gen: v5e
topology: v5e:2x2
jax: 0.10.0
libtpu: 0.0.40
codegen_flags: <defaults>
</compile_context>

<pallas_src>
import jax
import jax.numpy as jnp
from jax.experimental import pallas as pl
from jax.experimental.pallas import tpu as pltpu


def _scale_kernel(a_ref, b_ref, x_ref, o_ref):
    # a_ref, b_ref: (TM, 1) float32 per-row scale / offset (lane-broadcast)
    # x_ref, o_ref: (TM, TL) row x lane block of the flattened input / output
    x = x_ref[...].astype(jnp.float32)
    o_ref[...] = (a_ref[...] * x + b_ref[...]).astype(o_ref.dtype)


def _round_up(v, m):
    return ((v + m - 1) // m) * m


def scale_forward(x, variance, mean, *,
                  target_block_bytes=4 * 1024 * 1024,
                  min_pallas_bytes=1 << 20,
                  force_kernel=False):
    """x: (N, C, H, W); variance, mean: (1, C, 1, 1). Returns variance*x+mean."""
    N, C, H, W = x.shape
    NC, L = N * C, H * W
    dtype = x.dtype
    bytes_el = jnp.dtype(dtype).itemsize

    # Tiny tensors: a single fused XLA FMA beats a grid=(1,1) pallas_call.
    if not force_kernel and NC * L * bytes_el < min_pallas_bytes:
        v32 = variance.astype(jnp.float32)
        m32 = mean.astype(jnp.float32)
        return (v32 * x.astype(jnp.float32) + m32).astype(dtype)

    LANE = 128
    SUB = 8 * max(1, 4 // bytes_el)          # 8 (f32) / 16 (bf16) / 32 (int8)

    # ---- lane-axis tile: prefer the full 128-padded row (contiguous DMA) ----
    L128 = _round_up(L, LANE)
    tl_cap = max(LANE, (target_block_bytes // (SUB * bytes_el)) // LANE * LANE)
    TL = min(L128, tl_cap)
    grid_l = pl.cdiv(L, TL)
    if grid_l > 1:                            # even out lane blocks
        TL = _round_up(pl.cdiv(L128, grid_l), LANE)
        grid_l = pl.cdiv(L, TL)

    # ---- row-axis tile: x block ~= target_block_bytes ----
    tm_target = max(SUB, (target_block_bytes // (TL * bytes_el)) // SUB * SUB)
    tm_target = min(tm_target, _round_up(NC, SUB))
    grid_m = pl.cdiv(NC, tm_target)
    TM = _round_up(pl.cdiv(NC, grid_m), SUB)  # evened-out, multiple of SUB
    grid_m = pl.cdiv(NC, TM)

    # ---- per-row (f32) scale / offset; kept f32 for bf16-input precision ----
    a = jnp.broadcast_to(variance.reshape(1, C).astype(jnp.float32),
                         (N, C)).reshape(NC, 1)
    b = jnp.broadcast_to(mean.reshape(1, C).astype(jnp.float32),
                         (N, C)).reshape(NC, 1)

    # ---- VMEM budget: double-buffered x in + out + a/b blocks, headroom ----
    x_block_bytes = TM * TL * bytes_el
    ab_block_bytes = TM * LANE * 4            # lane-padded f32 VMEM layout
    vmem_est = 4 * x_block_bytes + 4 * ab_block_bytes + (1 << 20)
    vmem_limit = int(min(max(vmem_est, 32 * 1024 * 1024), 48 * 1024 * 1024))

    cost = pl.CostEstimate(
        flops=2 * NC * L,
        transcendentals=0,
        bytes_accessed=2 * NC * L * bytes_el + 2 * NC * 4,
    )

    out2d = pl.pallas_call(
        _scale_kernel,
        out_shape=jax.ShapeDtypeStruct((NC, L), dtype),
        grid_spec=pltpu.PrefetchScalarGridSpec(
            num_scalar_prefetch=0,
            grid=(grid_m, grid_l),
            in_specs=[
                # a/b depend only on the row-grid index; lane axis is the
                # innermost grid axis so these tiny DMAs fire once per row
                # block rather than once per grid step.
                pl.BlockSpec((TM, 1), lambda i, j: (i, 0)),
                pl.BlockSpec((TM, 1), lambda i, j: (i, 0)),
                pl.BlockSpec((TM, TL), lambda i, j: (i, j)),
            ],
            out_specs=pl.BlockSpec((TM, TL), lambda i, j: (i, j)),
        ),
        compiler_params=pltpu.CompilerParams(
            dimension_semantics=("parallel", "parallel"),
            vmem_limit_bytes=vmem_limit,
        ),
        cost_estimate=cost,
    )(a, b, x.reshape(NC, L))

    return out2d.reshape(N, C, H, W)


if __name__ == "__main__":
    # Small shapes consistent with the module: batch=2, channels=4, spatial=16.
    N, C, H, W = 2, 4, 16, 16

    key = jax.random.PRNGKey(0)
    kx, kv, km = jax.random.split(key, 3)

    x = jax.random.normal(kx, (N, C, H, W), dtype=jnp.float32)

    # nn.Parameter shapes (1, C, 1, 1): mean init zeros, variance init ones;
    # perturb deterministically so the affine transform is non-trivial.
    variance = jnp.ones((1, C, 1, 1), jnp.float32) + 0.1 * jax.random.normal(
        kv, (1, C, 1, 1), dtype=jnp.float32
    )
    mean = jnp.zeros((1, C, 1, 1), jnp.float32) + 0.1 * jax.random.normal(
        km, (1, C, 1, 1), dtype=jnp.float32
    )

    # Force the Pallas path even though this demo tensor is tiny.
    out = jax.block_until_ready(scale_forward(x, variance, mean, force_kernel=True))
    ref = variance * x + mean
    assert out.shape == x.shape
    assert jnp.allclose(out, ref, atol=1e-6, rtol=1e-6), "mismatch vs reference"

    # Default (short-circuit) path on the same tiny tensor.
    out_sc = jax.block_until_ready(scale_forward(x, variance, mean))
    assert jnp.allclose(out_sc, ref, atol=1e-6, rtol=1e-6), "mismatch (short-circuit)"

    # Non-aligned shapes (NC % 8 != 0, L % 128 != 0): exercises the pad-free
    # uneven-boundary handling path.
    N2, C2, H2, W2 = 3, 5, 24, 24
    x2 = jax.random.normal(kx, (N2, C2, H2, W2), dtype=jnp.float32)
    v2 = 1.0 + 0.1 * jax.random.normal(kv, (1, C2, 1, 1), dtype=jnp.float32)
    m2 = 0.1 * jax.random.normal(km, (1, C2, 1, 1), dtype=jnp.float32)
    out2 = jax.block_until_ready(scale_forward(x2, v2, m2, force_kernel=True))
    ref2 = v2 * x2 + m2
    assert jnp.allclose(out2, ref2, atol=1e-6, rtol=1e-6), "mismatch (uneven case)"

    # bf16 activations: exercises the dtype-aware sublane quantum (SUB=16) and
    # f32-parameter precision inside the kernel.
    N3, C3, H3, W3 = 2, 16, 32, 40
    x3 = jax.random.normal(kx, (N3, C3, H3, W3), dtype=jnp.float32).astype(jnp.bfloat16)
    v3 = 1.0 + 0.1 * jax.random.normal(kv, (1, C3, 1, 1), dtype=jnp.float32)
    m3 = 0.1 * jax.random.normal(km, (1, C3, 1, 1), dtype=jnp.float32)
    out3 = jax.block_until_ready(scale_forward(x3, v3, m3, force_kernel=True))
    ref3 = (v3 * x3.astype(jnp.float32) + m3).astype(jnp.bfloat16)
    assert jnp.allclose(out3.astype(jnp.float32), ref3.astype(jnp.float32),
                        atol=2e-2, rtol=2e-2), "mismatch (bf16 case)"

    print("KERNEL_OK")
</pallas_src>

<mosaic_0001>
module attributes {stable_mosaic.version = 11 : i64} {
  func.func @_scale_kernel(%arg0: i32, %arg1: i32, %arg2: memref<8x1xf32, #tpu.memory_space<vmem>>, %arg3: memref<8x1xf32, #tpu.memory_space<vmem>>, %arg4: memref<8x256xf32, #tpu.memory_space<vmem>>, %arg5: memref<8x256xf32, #tpu.memory_space<vmem>>) attributes {dimension_semantics = [#tpu.dimension_semantics<parallel>, #tpu.dimension_semantics<parallel>], iteration_bounds = array<i64: 1, 1>, scalar_prefetch = 0 : i64, scratch_operands = 0 : i64, tpu.core_type = #tpu.core_type<tc>, window_params = [{transform_indices = @transform_0, window_bounds = array<i64: 8, 1>}, {transform_indices = @transform_1, window_bounds = array<i64: 8, 1>}, {transform_indices = @transform_2, window_bounds = array<i64: 8, 256>}, {transform_indices = @transform_3, window_bounds = array<i64: 8, 256>}]} {
    %c0 = arith.constant 0 : index
    %c0_0 = arith.constant 0 : index
    %0 = vector.load %arg4[%c0, %c0_0] : memref<8x256xf32, #tpu.memory_space<vmem>>, vector<8x256xf32>
    %c0_1 = arith.constant 0 : index
    %c0_2 = arith.constant 0 : index
    %1 = vector.load %arg2[%c0_1, %c0_2] : memref<8x1xf32, #tpu.memory_space<vmem>>, vector<8x1xf32>
    %2 = vector.broadcast %1 : vector<8x1xf32> to vector<8x256xf32>
    %3 = arith.mulf %2, %0 : vector<8x256xf32>
    %c0_3 = arith.constant 0 : index
    %c0_4 = arith.constant 0 : index
    %4 = vector.load %arg3[%c0_3, %c0_4] : memref<8x1xf32, #tpu.memory_space<vmem>>, vector<8x1xf32>
    %5 = vector.broadcast %4 : vector<8x1xf32> to vector<8x256xf32>
    %6 = arith.addf %3, %5 : vector<8x256xf32>
    %c0_5 = arith.constant 0 : index
    %c0_6 = arith.constant 0 : index
    %7 = vector.load %arg5[%c0_5, %c0_6] : memref<8x256xf32, #tpu.memory_space<vmem>>, vector<8x256xf32>
    tpu.vector_store %arg5[%c0_5, %c0_6], %6 {strides = array<i32>} : memref<8x256xf32, #tpu.memory_space<vmem>>, vector<8x256xf32>,
    return
  }
  func.func @transform_0(%arg0: i32, %arg1: i32) -> (i32, i32) {
    %c0_i32 = arith.constant 0 : i32
    %c0_i32_0 = arith.constant 0 : i32
    return %arg0, %c0_i32 : i32, i32
  }
  func.func @transform_1(%arg0: i32, %arg1: i32) -> (i32, i32) {
    %c0_i32 = arith.constant 0 : i32
    %c0_i32_0 = arith.constant 0 : i32
    return %arg0, %c0_i32 : i32, i32
  }
  func.func @transform_2(%arg0: i32, %arg1: i32) -> (i32, i32) {
    %c0_i32 = arith.constant 0 : i32
    return %arg0, %arg1 : i32, i32
  }
  func.func @transform_3(%arg0: i32, %arg1: i32) -> (i32, i32) {
    %c0_i32 = arith.constant 0 : i32
    return %arg0, %arg1 : i32, i32
  }
}

</mosaic_0001>

<bundles_post_ra>
// kernel: tpu_custom_call.1
= control target key start
LH: loop header
LB: loop body
LE: loop exit
PB: predicated region body
PF: predicated region fallthrough
CT: control target
= control target key end

     0   :  { %s117_s0 = inlined_call_operand.vmem [shape: f32[8,1], index: 0, kind: input, shape index: {}]   ;;  %s118_s1 = inlined_call_operand.vmem [shape: f32[8,1], index: 1, kind: input, shape index: {}]   ;;  %s119_s2 = inlined_call_operand.vmem [shape: f32[8,256], index: 2, kind: input, shape index: {}]   ;;  %s120_s3 = inlined_call_operand.hbm [shape: f32[8,256], index: 3, kind: output, shape index: {}]  }
   0x1   :  { %v17_v0 = vld [vmem:[%s117_s0] sm:$0xff] }
   0x2   :  { %8 = vsyncpa [#allocation3], 0  ;;  %v80_v1 = vmov 0   ;;  %v25_v2 = vld [vmem:[%s118_s1] sm:$0xff]  ;;  %v16_v5 = vld [vmem:[%s119_s2 + $0x8] sm:$0xff]  ;;  %s81_s0 = smov [#allocation2]  }
   0x3   :  { %53 = vset.pattern.permute.xlu0 %v80_v1  ;;  %v15_v4 = vld [vmem:[%s119_s2] sm:$0xff]  ;;  %s40_s20 = sshll.u32 %s81_s0, 4  ;;  %s42_s23 = sshll.u32 %s120_s3, 4  ;;  %s41_s20 = int_to_ptr.vmem [resolvable:$true] %s40_s20  ;;  %s43_s23 = int_to_ptr.hbm [resolvable:$true] %s42_s23 }
   0x4   :  { %20 = vperm.xlu0 %53, %v17_v0  }
   0xc   :  { %28 = vperm.xlu0 %53, %v25_v2  }
  0x76   :  { %v21_v3 = vpop.permute.xlu0 %20 }
  0x77   :  { %v23_v6 = vmul.f32 %v21_v3, %v15_v4  ;;  %v24_v7 = vmul.f32 %v21_v3, %v16_v5 }
  0x7e   :  { %v29_v8 = vpop.permute.xlu0 %28 }
  0x7f   :  { %v31_v9 = vadd.f32 %v29_v8, %v23_v6  ;;  %v32_v10 = vadd.f32 %v29_v8, %v24_v7 }
  0x81   :  { %33 = vst [vmem:[#allocation2] sm:$0xff] %v31_v9 }
  0x82   :  { %34 = vst [vmem:[#allocation2 + $0x8] sm:$0xff] %v32_v10 }
  0x83   :  { %45 = dma.vmem_to_hbm [thread:$0]  %s41_s20, 256, %s43_s23, [#allocation3]  }
  0x84   :  { %78 = dma.done.wait [#allocation3], 256  }
  0x85   :  { %79 = vsyncadd [#allocation3], 4294967040 }
  0x86   :  { %50 = vsyncpa [#allocation3], 1 }

</bundles_post_ra>
